<compile_context>
chip_gen: v7x
topology: tpu7x:2x2x1
jax: 0.10.0
libtpu: 0.0.40
codegen_flags: <defaults>
</compile_context>

<pallas_src>
import functools

import jax
import jax.numpy as jnp
from jax.experimental import pallas as pl
from jax.experimental.pallas import tpu as pltpu


D_EMB = 2 * 32       # 64, embedding dim of u1/u2 (att1 input dim)
D_ATT = 100          # attention hidden dim (logical)
D_ATT_PAD = 128      # lane-dense padded attention hidden dim
N_CLS = 8            # language classes
_NEG = -1e30         # "minus infinity" for masked softmax rows


def _branch_kernel(x_ref, wm_ref, bm_ref, wa1_ref, ba1_ref, wa2_ref, ba2_ref,
                   u_ref, m_ref, l_ref, acc_ref, *, tile_t, t_rows):
    """One row tile of one branch: encoder + attention scores + softmax partials."""
    f32 = jnp.float32
    i = pl.program_id(0)

    # --- synthetic encoder tile: u = tanh(x @ Wm + bm) -> (tile_t, 64) ---
    u = jnp.tanh(jnp.dot(x_ref[...], wm_ref[...], preferred_element_type=f32)
                 + bm_ref[...])

    # Rows beyond t_rows are only sublane padding of the last (ragged) tile:
    # zero them so stale-VMEM garbage/NaNs cannot leak into the partials.
    row = jax.lax.broadcasted_iota(jnp.int32, (tile_t, 1), 0)
    valid = row < (t_rows - i * tile_t)
    u = jnp.where(valid, u, 0.0)
    u_ref[...] = u                       # boundary writeback is clamped to t_rows

    # --- ha = tanh(att1(u)): lane-dense 128-wide (zero padding is exact) ---
    ha = jnp.tanh(jnp.dot(u, wa1_ref[...], preferred_element_type=f32)
                  + ba1_ref[...])                               # (tile_t, 128)

    # --- alp = tanh(att2(ha)): the (100,1) matmul as VPU mul + lane reduce ---
    # TODO(synk): the score path is lane-sparse ((tile_t,1) columns); densify it
    # only if profiling shows the single EUP slot binding.
    alp = jnp.tanh(jnp.sum(ha * wa2_ref[...], axis=-1, keepdims=True)
                   + ba2_ref[...])                              # (tile_t, 1)
    alp = jnp.where(valid, alp, _NEG)

    # --- per-tile softmax partials (combined associatively outside) ---
    m_i = jnp.max(alp, axis=0, keepdims=True)                   # (1,1), finite
    p = jnp.exp(alp - m_i)                                      # masked rows -> 0
    l_i = jnp.sum(p, axis=0, keepdims=True)                     # (1,1)
    acc_i = jnp.sum(p * u, axis=0, keepdims=True)               # (1,64)

    m_ref[...] = m_i.reshape((1, 1, 1))
    l_ref[...] = l_i.reshape((1, 1, 1))
    acc_ref[...] = acc_i.reshape((1, 1, D_EMB))


def _round_up(x, m):
    return (x + m - 1) // m * m


def _branch_forward(x, wm, bm, att_params, *, tile_t):
    """Encoder + attention-score pass for one branch.

    Returns (u (T,64), m (n,1,1), l (n,1,1), acc (n,1,64)) per-tile partials."""
    f32 = jnp.float32
    x = x.astype(f32)
    t, f_in = x.shape
    wa1, ba1, wa2, ba2 = att_params

    tile = _round_up(max(1, min(tile_t, t)), 8)   # multiple of 8 sublanes
    n_tiles = pl.cdiv(t, tile)

    const2 = lambda i: (0, 0)
    in_specs = [
        pl.BlockSpec((tile, f_in), lambda i: (i, 0)),     # x row tile (pipelined)
        pl.BlockSpec((f_in, D_EMB), const2),              # Wm  (resident)
        pl.BlockSpec((1, D_EMB), const2),                 # bm
        pl.BlockSpec((D_EMB, D_ATT_PAD), const2),         # Wa1 (lane-padded)
        pl.BlockSpec((1, D_ATT_PAD), const2),             # ba1 (lane-padded)
        pl.BlockSpec((1, D_ATT_PAD), const2),             # wa2 as a lane row
        pl.BlockSpec((1, 1), const2),                     # ba2 scalar
    ]
    out_specs = (
        pl.BlockSpec((tile, D_EMB), lambda i: (i, 0)),       # u tile
        pl.BlockSpec((1, 1, 1), lambda i: (i, 0, 0)),        # m_i
        pl.BlockSpec((1, 1, 1), lambda i: (i, 0, 0)),        # l_i
        pl.BlockSpec((1, 1, D_EMB), lambda i: (i, 0, 0)),    # acc_i
    )
    out_shape = (
        jax.ShapeDtypeStruct((t, D_EMB), f32),               # exact module shape
        jax.ShapeDtypeStruct((n_tiles, 1, 1), f32),
        jax.ShapeDtypeStruct((n_tiles, 1, 1), f32),
        jax.ShapeDtypeStruct((n_tiles, 1, D_EMB), f32),
    )

    weight_elems = (f_in * D_EMB + D_EMB + D_EMB * D_ATT_PAD + 2 * D_ATT_PAD + 1)
    cost = pl.CostEstimate(
        flops=int(2 * t * f_in * D_EMB + 2 * t * D_EMB * D_ATT_PAD
                  + 3 * t * D_ATT_PAD + 4 * t * D_EMB),
        transcendentals=int(t * (D_EMB + D_ATT_PAD + 2)),
        bytes_accessed=int(4 * (t * f_in + t * D_EMB + weight_elems
                                + n_tiles * (D_EMB + 2))),
    )
    # double-buffered x/u tiles + resident weights + (tile,128) intermediates
    vmem_bytes = 4 * (2 * tile * f_in + 2 * tile * D_EMB + 2 * tile * D_ATT_PAD
                      + 2 * weight_elems + 2 * (D_EMB + 2))
    vmem_limit = int(min(max(4 * vmem_bytes, 8 * 1024 * 1024), 32 * 1024 * 1024))

    kernel = functools.partial(_branch_kernel, tile_t=tile, t_rows=t)
    return pl.pallas_call(
        kernel,
        out_shape=out_shape,
        grid_spec=pltpu.PrefetchScalarGridSpec(
            num_scalar_prefetch=0,
            grid=(n_tiles,),
            in_specs=in_specs,
            out_specs=out_specs),
        compiler_params=pltpu.CompilerParams(
            dimension_semantics=("parallel",),   # tiles are now independent
            vmem_limit_bytes=vmem_limit),
        cost_estimate=cost,
    )(x, wm, bm, wa1, ba1, wa2, ba2)


def msa_dat_net(x1, x2, params, *, tile_t=512):
    """Whole MSA_DAT_Net forward. Returns (lang (1,8), u1 (T1,64), u2 (T2,64))."""
    # Lane-dense zero padding of the attention params (mathematically exact:
    # tanh(0) = 0 and the padded wa2 entries are zero). Done once, shared by
    # both branch calls.
    wa1 = jnp.pad(params["wa1"], ((0, 0), (0, D_ATT_PAD - D_ATT)))
    ba1 = jnp.pad(params["ba1"], ((0, 0), (0, D_ATT_PAD - D_ATT)))
    wa2 = jnp.pad(params["wa2"].reshape(1, D_ATT), ((0, 0), (0, D_ATT_PAD - D_ATT)))
    ba2 = params["ba2"].reshape(1, 1)
    att = (wa1, ba1, wa2, ba2)

    u1, m1, l1, a1 = _branch_forward(x1, params["wm1"], params["bm1"], att,
                                     tile_t=tile_t)
    u2, m2, l2, a2 = _branch_forward(x2, params["wm2"], params["bm2"], att,
                                     tile_t=tile_t)

    # --- associative softmax combine (exact) + language classifier (tiny; JAX) ---
    m = jnp.concatenate([m1.reshape(-1), m2.reshape(-1)])
    l = jnp.concatenate([l1.reshape(-1), l2.reshape(-1)])
    a = jnp.concatenate([a1.reshape(-1, D_EMB), a2.reshape(-1, D_EMB)])
    m_glob = jnp.max(m)
    w = jnp.exp(m - m_glob)
    u_vec = (jnp.sum(w[:, None] * a, axis=0, keepdims=True)
             / jnp.sum(w * l))                                   # (1, 64), exact div
    lang = (jnp.dot(u_vec, params["wc"], precision=jax.lax.Precision.HIGHEST)
            + params["bc"])                                      # (1, 8)
    return lang, u1, u2


def init_params(key, f_in):
    """Parameter init mirroring the nn.Module's shapes.

    nn.Linear(in, out) has weight (out, in); stored pre-transposed (in, out)."""
    ks = jax.random.split(key, 10)

    def lin(kw, kb, fan_in, fan_out):
        s = 1.0 / jnp.sqrt(jnp.float32(fan_in))
        w = jax.random.uniform(kw, (fan_in, fan_out), jnp.float32, -s, s)
        b = jax.random.uniform(kb, (1, fan_out), jnp.float32, -s, s)
        return w, b

    wm1, bm1 = lin(ks[0], ks[1], f_in, D_EMB)    # synthetic model1
    wm2, bm2 = lin(ks[2], ks[3], f_in, D_EMB)    # synthetic model2
    wa1, ba1 = lin(ks[4], ks[5], D_EMB, D_ATT)   # att1: Linear(64, 100)
    wa2, ba2 = lin(ks[6], ks[7], D_ATT, 1)       # att2: Linear(100, 1)
    wc,  bc  = lin(ks[8], ks[9], D_EMB, N_CLS)   # lang_classifier.fc1: Linear(64, 8)
    return dict(wm1=wm1, bm1=bm1, wm2=wm2, bm2=bm2,
                wa1=wa1, ba1=ba1, wa2=wa2, ba2=ba2, wc=wc, bc=bc)


def _reference(x1, x2, p):
    """Plain-JAX reference of the same forward, for a sanity check."""
    hp = jax.lax.Precision.HIGHEST
    u1 = jnp.tanh(jnp.dot(x1, p["wm1"], precision=hp) + p["bm1"])
    u2 = jnp.tanh(jnp.dot(x2, p["wm2"], precision=hp) + p["bm2"])
    ht = jnp.concatenate([u1, u2], axis=0)
    ha = jnp.tanh(jnp.dot(ht, p["wa1"], precision=hp) + p["ba1"])
    alp = jnp.tanh(jnp.dot(ha, p["wa2"], precision=hp) + p["ba2"])
    al = jax.nn.softmax(alp, axis=0)
    u_vec = jnp.sum(al * ht, axis=0, keepdims=True)
    lang = jnp.dot(u_vec, p["wc"], precision=hp) + p["bc"]
    return lang, u1, u2


if __name__ == "__main__":
    key = jax.random.PRNGKey(0)
    k_x1, k_x2, k_p = jax.random.split(key, 3)

    # Small but non-trivial: with tile_t=64 neither T1 nor T2 is a tile
    # multiple, so the ragged-last-tile masking path is exercised; with the
    # large default tile each branch runs as a single grid step.
    T1, T2, F_IN = 136, 104, 32
    x1 = jax.random.normal(k_x1, (T1, F_IN), jnp.float32)
    x2 = jax.random.normal(k_x2, (T2, F_IN), jnp.float32)
    params = init_params(k_p, F_IN)

    ref_lang, ref_u1, ref_u2 = _reference(x1, x2, params)

    for tile_t in (64, 512):
        lang_out, u1, u2 = msa_dat_net(x1, x2, params, tile_t=tile_t)
        jax.block_until_ready((lang_out, u1, u2))

        assert lang_out.shape == (1, N_CLS)
        assert u1.shape == (T1, D_EMB) and u2.shape == (T2, D_EMB)
        assert jnp.allclose(u1, ref_u1, atol=1e-3, rtol=1e-3)
        assert jnp.allclose(u2, ref_u2, atol=1e-3, rtol=1e-3)
        assert jnp.allclose(lang_out, ref_lang, atol=1e-3, rtol=1e-3)

    print("KERNEL_OK")
</pallas_src>

<mosaic_0001>
module attributes {stable_mosaic.version = 11 : i64} {
  func.func @_branch_kernel(%arg0: i32, %arg1: memref<64x32xf32, #tpu.memory_space<vmem>>, %arg2: memref<32x64xf32, #tpu.memory_space<vmem>>, %arg3: memref<1x64xf32, #tpu.memory_space<vmem>>, %arg4: memref<64x128xf32, #tpu.memory_space<vmem>>, %arg5: memref<1x128xf32, #tpu.memory_space<vmem>>, %arg6: memref<1x128xf32, #tpu.memory_space<vmem>>, %arg7: memref<1x1xf32, #tpu.memory_space<vmem>>, %arg8: memref<64x64xf32, #tpu.memory_space<vmem>>, %arg9: memref<1x1x1xf32, #tpu.memory_space<vmem>>, %arg10: memref<1x1x1xf32, #tpu.memory_space<vmem>>, %arg11: memref<1x1x64xf32, #tpu.memory_space<vmem>>) attributes {dimension_semantics = [#tpu.dimension_semantics<parallel>], iteration_bounds = array<i64: 3>, scalar_prefetch = 0 : i64, scratch_operands = 0 : i64, tpu.core_type = #tpu.core_type<tc>, window_params = [{transform_indices = @transform_0, window_bounds = array<i64: 64, 32>}, {pipeline_mode = #tpu.pipeline_mode<synchronous>, transform_indices = @transform_1, window_bounds = array<i64: 32, 64>}, {pipeline_mode = #tpu.pipeline_mode<synchronous>, transform_indices = @transform_2, window_bounds = array<i64: 1, 64>}, {pipeline_mode = #tpu.pipeline_mode<synchronous>, transform_indices = @transform_3, window_bounds = array<i64: 64, 128>}, {pipeline_mode = #tpu.pipeline_mode<synchronous>, transform_indices = @transform_4, window_bounds = array<i64: 1, 128>}, {pipeline_mode = #tpu.pipeline_mode<synchronous>, transform_indices = @transform_5, window_bounds = array<i64: 1, 128>}, {pipeline_mode = #tpu.pipeline_mode<synchronous>, transform_indices = @transform_6, window_bounds = array<i64: 1, 1>}, {transform_indices = @transform_7, window_bounds = array<i64: 64, 64>}, {transform_indices = @transform_8, window_bounds = array<i64: 1, 1, 1>}, {transform_indices = @transform_9, window_bounds = array<i64: 1, 1, 1>}, {transform_indices = @transform_10, window_bounds = array<i64: 1, 1, 64>}]} {
    %c0 = arith.constant 0 : index
    %c0_0 = arith.constant 0 : index
    %0 = vector.load %arg1[%c0, %c0_0] : memref<64x32xf32, #tpu.memory_space<vmem>>, vector<64x32xf32>
    %c0_1 = arith.constant 0 : index
    %c0_2 = arith.constant 0 : index
    %1 = vector.load %arg2[%c0_1, %c0_2] : memref<32x64xf32, #tpu.memory_space<vmem>>, vector<32x64xf32>
    %cst = arith.constant dense<0.000000e+00> : vector<64x64xf32>
    %2 = tpu.matmul %0, %1, %cst {dimension_numbers = #tpu.dot_dimension_numbers<[1], [0], [0], [1], [0, 0, 1, 1], [], []>} : vector<64x32xf32>, vector<32x64xf32>, vector<64x64xf32> -> vector<64x64xf32>
    %c0_3 = arith.constant 0 : index
    %c0_4 = arith.constant 0 : index
    %3 = vector.load %arg3[%c0_3, %c0_4] : memref<1x64xf32, #tpu.memory_space<vmem>>, vector<1x64xf32>
    %4 = vector.broadcast %3 : vector<1x64xf32> to vector<64x64xf32>
    %5 = arith.addf %2, %4 : vector<64x64xf32>
    %6 = math.tanh %5 : vector<64x64xf32>
    %7 = tpu.iota {dimensions = array<i32: 0>} : vector<64x1xi32>
    %c64_i32 = arith.constant 64 : i32
    %8 = arith.muli %arg0, %c64_i32 : i32
    %c136_i32 = arith.constant 136 : i32
    %9 = arith.subi %c136_i32, %8 : i32
    %10 = vector.broadcast %9 : i32 to vector<64x1xi32>
    %11 = arith.cmpi slt, %7, %10 : vector<64x1xi32>
    %cst_5 = arith.constant 0.000000e+00 : f32
    %12 = vector.shape_cast %11 : vector<64x1xi1> to vector<64x1xi1>
    %13 = vector.broadcast %12 : vector<64x1xi1> to vector<64x64xi1>
    %14 = vector.broadcast %cst_5 : f32 to vector<64x64xf32>
    %15 = arith.select %13, %6, %14 : vector<64x64xi1>, vector<64x64xf32>
    %c0_6 = arith.constant 0 : index
    %c0_7 = arith.constant 0 : index
    %16 = vector.load %arg8[%c0_6, %c0_7] : memref<64x64xf32, #tpu.memory_space<vmem>>, vector<64x64xf32>
    tpu.vector_store %arg8[%c0_6, %c0_7], %15 {strides = array<i32>} : memref<64x64xf32, #tpu.memory_space<vmem>>, vector<64x64xf32>,
    %c0_8 = arith.constant 0 : index
    %c0_9 = arith.constant 0 : index
    %17 = vector.load %arg4[%c0_8, %c0_9] : memref<64x128xf32, #tpu.memory_space<vmem>>, vector<64x128xf32>
    %cst_10 = arith.constant dense<0.000000e+00> : vector<64x128xf32>
    %18 = tpu.matmul %15, %17, %cst_10 {dimension_numbers = #tpu.dot_dimension_numbers<[1], [0], [0], [1], [0, 0, 1, 1], [], []>} : vector<64x64xf32>, vector<64x128xf32>, vector<64x128xf32> -> vector<64x128xf32>
    %c0_11 = arith.constant 0 : index
    %c0_12 = arith.constant 0 : index
    %19 = vector.load %arg5[%c0_11, %c0_12] : memref<1x128xf32, #tpu.memory_space<vmem>>, vector<1x128xf32>
    %20 = vector.broadcast %19 : vector<1x128xf32> to vector<64x128xf32>
    %21 = arith.addf %18, %20 : vector<64x128xf32>
    %22 = math.tanh %21 : vector<64x128xf32>
    %c0_13 = arith.constant 0 : index
    %c0_14 = arith.constant 0 : index
    %23 = vector.load %arg6[%c0_13, %c0_14] : memref<1x128xf32, #tpu.memory_space<vmem>>, vector<1x128xf32>
    %24 = vector.broadcast %23 : vector<1x128xf32> to vector<64x128xf32>
    %25 = arith.mulf %22, %24 : vector<64x128xf32>
    %cst_15 = arith.constant dense<0.000000e+00> : vector<64xf32>
    %26 = vector.multi_reduction <add>, %25, %cst_15 [1] : vector<64x128xf32> to vector<64xf32>
    %27 = vector.shape_cast %26 : vector<64xf32> to vector<64x1xf32>
    %c0_16 = arith.constant 0 : index
    %c0_17 = arith.constant 0 : index
    %28 = vector.load %arg7[%c0_16, %c0_17] : memref<1x1xf32, #tpu.memory_space<vmem>>, vector<1x1xf32>
    %29 = vector.broadcast %28 : vector<1x1xf32> to vector<64x1xf32>
    %30 = arith.addf %27, %29 : vector<64x1xf32>
    %31 = math.tanh %30 : vector<64x1xf32>
    %cst_18 = arith.constant -1.000000e+30 : f32
    %32 = vector.broadcast %cst_18 : f32 to vector<64x1xf32>
    %33 = arith.select %11, %31, %32 : vector<64x1xi1>, vector<64x1xf32>
    %cst_19 = arith.constant dense<0xFF800000> : vector<1xf32>
    %34 = vector.multi_reduction <maximumf>, %33, %cst_19 [0] : vector<64x1xf32> to vector<1xf32>
    %35 = vector.shape_cast %34 : vector<1xf32> to vector<1x1xf32>
    %36 = vector.broadcast %35 : vector<1x1xf32> to vector<64x1xf32>
    %37 = arith.subf %33, %36 : vector<64x1xf32>
    %38 = math.exp %37 : vector<64x1xf32>
    %cst_20 = arith.constant dense<0.000000e+00> : vector<1xf32>
    %39 = vector.multi_reduction <add>, %38, %cst_20 [0] : vector<64x1xf32> to vector<1xf32>
    %40 = vector.shape_cast %39 : vector<1xf32> to vector<1x1xf32>
    %41 = vector.broadcast %38 : vector<64x1xf32> to vector<64x64xf32>
    %42 = arith.mulf %41, %15 : vector<64x64xf32>
    %cst_21 = arith.constant dense<0.000000e+00> : vector<64xf32>
    %43 = vector.multi_reduction <add>, %42, %cst_21 [0] : vector<64x64xf32> to vector<64xf32>
    %44 = vector.shape_cast %43 : vector<64xf32> to vector<1x64xf32>
    %45 = vector.shape_cast %35 : vector<1x1xf32> to vector<1x1x1xf32>
    %c0_22 = arith.constant 0 : index
    %c0_23 = arith.constant 0 : index
    %c0_24 = arith.constant 0 : index
    %46 = vector.load %arg9[%c0_22, %c0_23, %c0_24] : memref<1x1x1xf32, #tpu.memory_space<vmem>>, vector<1x1x1xf32>
    tpu.vector_store %arg9[%c0_22, %c0_23, %c0_24], %45 {strides = array<i32>} : memref<1x1x1xf32, #tpu.memory_space<vmem>>, vector<1x1x1xf32>,
    %47 = vector.shape_cast %40 : vector<1x1xf32> to vector<1x1x1xf32>
    %c0_25 = arith.constant 0 : index
    %c0_26 = arith.constant 0 : index
    %c0_27 = arith.constant 0 : index
    %48 = vector.load %arg10[%c0_25, %c0_26, %c0_27] : memref<1x1x1xf32, #tpu.memory_space<vmem>>, vector<1x1x1xf32>
    tpu.vector_store %arg10[%c0_25, %c0_26, %c0_27], %47 {strides = array<i32>} : memref<1x1x1xf32, #tpu.memory_space<vmem>>, vector<1x1x1xf32>,
    %49 = vector.shape_cast %44 : vector<1x64xf32> to vector<1x1x64xf32>
    %c0_28 = arith.constant 0 : index
    %c0_29 = arith.constant 0 : index
    %c0_30 = arith.constant 0 : index
    %50 = vector.load %arg11[%c0_28, %c0_29, %c0_30] : memref<1x1x64xf32, #tpu.memory_space<vmem>>, vector<1x1x64xf32>
    tpu.vector_store %arg11[%c0_28, %c0_29, %c0_30], %49 {strides = array<i32>} : memref<1x1x64xf32, #tpu.memory_space<vmem>>, vector<1x1x64xf32>,
    return
  }
  func.func @transform_0(%arg0: i32) -> (i32, i32) {
    %c0_i32 = arith.constant 0 : i32
    %c0_i32_0 = arith.constant 0 : i32
    return %arg0, %c0_i32 : i32, i32
  }
  func.func @transform_1(%arg0: i32) -> (i32, i32) {
    %c0_i32 = arith.constant 0 : i32
    %c0_i32_0 = arith.constant 0 : i32
    %c0_i32_1 = arith.constant 0 : i32
    return %c0_i32, %c0_i32_0 : i32, i32
  }
  func.func @transform_2(%arg0: i32) -> (i32, i32) {
    %c0_i32 = arith.constant 0 : i32
    %c0_i32_0 = arith.constant 0 : i32
    %c0_i32_1 = arith.constant 0 : i32
    return %c0_i32, %c0_i32_0 : i32, i32
  }
  func.func @transform_3(%arg0: i32) -> (i32, i32) {
    %c0_i32 = arith.constant 0 : i32
    %c0_i32_0 = arith.constant 0 : i32
    %c0_i32_1 = arith.constant 0 : i32
    return %c0_i32, %c0_i32_0 : i32, i32
  }
  func.func @transform_4(%arg0: i32) -> (i32, i32) {
    %c0_i32 = arith.constant 0 : i32
    %c0_i32_0 = arith.constant 0 : i32
    %c0_i32_1 = arith.constant 0 : i32
    return %c0_i32, %c0_i32_0 : i32, i32
  }
  func.func @transform_5(%arg0: i32) -> (i32, i32) {
    %c0_i32 = arith.constant 0 : i32
    %c0_i32_0 = arith.constant 0 : i32
    %c0_i32_1 = arith.constant 0 : i32
    return %c0_i32, %c0_i32_0 : i32, i32
  }
  func.func @transform_6(%arg0: i32) -> (i32, i32) {
    %c0_i32 = arith.constant 0 : i32
    %c0_i32_0 = arith.constant 0 : i32
    %c0_i32_1 = arith.constant 0 : i32
    return %c0_i32, %c0_i32_0 : i32, i32
  }
  func.func @transform_7(%arg0: i32) -> (i32, i32) {
    %c0_i32 = arith.constant 0 : i32
    %c0_i32_0 = arith.constant 0 : i32
    return %arg0, %c0_i32 : i32, i32
  }
  func.func @transform_8(%arg0: i32) -> (i32, i32, i32) {
    %c0_i32 = arith.constant 0 : i32
    %c0_i32_0 = arith.constant 0 : i32
    %c0_i32_1 = arith.constant 0 : i32
    return %arg0, %c0_i32, %c0_i32_0 : i32, i32, i32
  }
  func.func @transform_9(%arg0: i32) -> (i32, i32, i32) {
    %c0_i32 = arith.constant 0 : i32
    %c0_i32_0 = arith.constant 0 : i32
    %c0_i32_1 = arith.constant 0 : i32
    return %arg0, %c0_i32, %c0_i32_0 : i32, i32, i32
  }
  func.func @transform_10(%arg0: i32) -> (i32, i32, i32) {
    %c0_i32 = arith.constant 0 : i32
    %c0_i32_0 = arith.constant 0 : i32
    %c0_i32_1 = arith.constant 0 : i32
    return %arg0, %c0_i32, %c0_i32_0 : i32, i32, i32
  }
}

</mosaic_0001>

<bundles_post_ra>
// kernel: tpu_custom_call.1
= control target key start
LH: loop header
LB: loop body
LE: loop exit
PB: predicated region body
PF: predicated region fallthrough
CT: control target
= control target key end

     0   :  { %s2229_s0 = inlined_call_operand.vmem [shape: f32[136,32], index: 0, kind: input, shape index: {}]   ;;  %s2230_s1 = inlined_call_operand.vmem [shape: f32[32,64], index: 1, kind: input, shape index: {}]   ;;  %s2231_s2 = inlined_call_operand.vmem [shape: f32[1,64], index: 2, kind: input, shape index: {}]   ;;  %s2232_s3 = inlined_call_operand.vmem [shape: f32[64,128], index: 3, kind: input, shape index: {}]   ;;  %s2233_s4 = inlined_call_operand.vmem [shape: f32[1,128], index: 4, kind: input, shape index: {}]   ;;  %s2234_s5 = inlined_call_operand.vmem [shape: f32[1,128], index: 5, kind: input, shape index: {}]   ;;  %s2235_s6 = inlined_call_operand.<no memory space> [shape: f32[1,1], index: 6, kind: input, shape index: {}]   ;;  %s2236_s7 = inlined_call_operand.vmem [shape: f32[136,64], index: 7, kind: output, shape index: {0}]   ;;  %s2237_s8 = inlined_call_operand.vmem [shape: f32[3,1,1], index: 8, kind: output, shape index: {1}]   ;;  %s2238_s9 = inlined_call_operand.vmem [shape: f32[3,1,1], index: 9, kind: output, shape index: {2}]   ;;  %s2239_s10 = inlined_call_operand.hbm [shape: f32[3,1,64], index: 10, kind: output, shape index: {3}]  }
   0x1   :  { %2241 = sst [smem:[#allocation7_spill]] %s2229_s0  ;;  %v16_v0 = vstv %s2235_s6 }
   0x2   :  { %2242 = sst [smem:[#allocation8_spill]] %s2230_s1  ;;  %17 = vst [vmem:[#allocation2] sm:$0x1] %v16_v0 }
   0x3   :  { %2243 = sst [smem:[#allocation9_spill]] %s2231_s2 }
   0x4   :  { %2244 = sst [smem:[#allocation10_spill]] %s2232_s3 }
   0x5   :  { %2245 = sst [smem:[#allocation11_spill]] %s2233_s4 }
   0x6   :  { %18 = vsyncpa [#allocation5], 0 }
   0x7   :  { %20 = vsyncpa [#allocation5 + $0x1], 0  ;;  %s1827_s15 = smov 0   ;;  %s1829_s16 = smov 0  }
   0x8   :  { %s1831_s17 = smov 0   ;;  %s1833_s18 = smov 0  }
   0x9 LB: > { %s1848_s6 = sadd.s32 4294967295, %s1733_s18   ;;  %s1312_s19 = sadd.s32 4294967294, %s1733_s18   ;;  %s1733_s18 = sphi %s1833_s18, %s2261_s18   ;;  %s1729_s17 = sphi %s1831_s17, %s2260_s17   ;;  %s1725_s16 = sphi %s1829_s16, %s2259_s16   ;;  %s1721_s15 = sphi %s1827_s15, %s2258_s15  }
   0xa   : > { %s1852_s20 = sadd.s32 1, %s1733_s18   ;;  %s185_s21 = sadd.s32 1, %s1729_s17 }
   0xb   : > { %s182_s22 = ssub.s32 %s1733_s18, %s1852_s20  ;;  %p195_p0 = scmp.ne.s32.totalorder %s1729_s17, %s1725_s16 }
   0xc   : > { %p183_p1 = scmp.eq.s32.totalorder %s182_s22, 0  ;;  %p196_p2 = scmp.eq.s32.totalorder %s1848_s6, 2 }
   0xd   : > { %p279_p3 = scmp.ne.s32.totalorder %s1725_s16, %s1721_s15  ;;  %p280_p4 = scmp.eq.s32.totalorder %s1312_s19, 2 }
   0xe   : > { %s1863_s23 = scalar_select %p183_p1, %s1729_s17, %s185_s21  }
   0xf   : > { %p1865_p5 = por %p196_p2, %p195_p0  ;;  %p1869_p6 = por %p280_p4, %p279_p3 }
  0x10   : > { %p1315_p7 = scmp.ge.s32.totalorder %s1733_s18, 1  ;;  %p333_p8 = scmp.lt.s32.totalorder %s1733_s18, 4 }
  0x12   : > { %p334_p9 = pnand %p1315_p7, %p333_p8 }
  0x13   : > { %s2248_s1 = sld [smem:[#allocation8_spill]] (!%p334_p9)  ;;  %s1885_s12 = sshll.u32 (!%p334_p9), %s1848_s6, 3  ;;  %vm428_vm0 = vcmask (!%p334_p9), 261120   ;;  %v566_v28 = vlaneseq (!%p334_p9)  ;;  %vm610_vm3 = vcmask (!%p334_p9), 523264   ;;  %vm833_vm10 = vcmask (!%p334_p9), 7168  }
  0x14   : > { %337 = sbr.rel (%p334_p9) target bundleno = 941 (0x3ad), region = 48  ;;  %p389_p10 = scmp.lt.s32.totalorder (!%p334_p9), %s1885_s12, 16  ;;  %vm969_vm11 = vcmask (!%p334_p9), 0   ;;  %vm972_vm12 = vcmask (!%p334_p9), 516096  }
  0x15   : > { %s2249_s0 = sld [smem:[#allocation7_spill]] (!%p334_p9)  ;;  %s2250_s3 = sld [smem:[#allocation10_spill]] (!%p334_p9)  ;;  %v1934_v33 = vshrl.u32 (!%p334_p9), %v566_v28, 7 }
  0x16   : > { %s1928_s14 = sand.u32 (!%p334_p9), 1, %s1725_s16   ;;  %s2251_s2 = sld [smem:[#allocation9_spill]] (!%p334_p9) }
  0x17   : > { %s1328_s22 = sshll.u32 (!%p334_p9), %s1848_s6, 6  ;;  %v1939_v38 = vadd.s32 (!%p334_p9), 8, %v1934_v33  ;;  %v1947_v44 = vadd.s32 (!%p334_p9), 24, %v1934_v33  ;;  %v1952_v46 = vadd.s32 (!%p334_p9), 16, %v1934_v33  ;;  %v1972_v54 = vadd.s32 (!%p334_p9), 40, %v1934_v33  ;;  %s2252_s4 = sld [smem:[#allocation11_spill]] (!%p334_p9) }
  0x18   : > { %s576_s26 = ssub.s32 (!%p334_p9), 136, %s1328_s22  ;;  %v1982_v55 = vadd.s32 (!%p334_p9), 32, %v1934_v33  ;;  %v2002_v60 = vadd.s32 (!%p334_p9), 56, %v1934_v33  ;;  %v2012_v61 = vadd.s32 (!%p334_p9), 48, %v1934_v33  ;;  %p403_p11 = scmp.lt.s32.totalorder (!%p334_p9), %s1848_s6, 2 }
  0x19   : > { %v417_v1 = vld [vmem:[%s2248_s1] sm:$0xff] (!%p334_p9)  ;;  %v418_v2 = vld [vmem:[%s2248_s1 + $0x8] sm:$0xff] (!%p334_p9)  ;;  %v419_v3 = vld [vmem:[%s2248_s1 + $0x10] sm:$0xff] (!%p334_p9)  ;;  %v1941_v40 = vstv (!%p334_p9), %s576_s26  ;;  %s2240_s13 = scalar_lea.vmem (!%p334_p9), [#allocation4], %s1928_s14 }
  0x1a   : > { %v1437_v4 = vpack.c.bf16 (!%p334_p9), %v418_v2, %v417_v1  ;;  %v420_v5 = vld [vmem:[%s2248_s1 + $0x18] sm:$0xff] (!%p334_p9)  ;;  %vm579_vm1 = vcmp.lt.s32.totalorder (!%p334_p9), %v1939_v38, %v1941_v40  ;;  %vm578_vm2 = vcmp.lt.s32.totalorder (!%p334_p9), %v1934_v33, %v1941_v40  ;;  %vm581_vm4 = vcmp.lt.s32.totalorder (!%p334_p9), %v1947_v44, %v1941_v40 }
  0x1b   : > { %v1441_v6 = vpack.c.bf16 %v420_v5, %v419_v3  ;;  %s390_s19 = scalar_select %p389_p10, %s1885_s12, 16  ;;  %v619_v15 = vld [vmem:[%s2250_s3] sm:$0xff]  ;;  %v620_v16 = vld [vmem:[%s2250_s3 + $0x8] sm:$0xff]  ;;  %v621_v18 = vld [vmem:[%s2250_s3 + $0x10] sm:$0xff]  ;;  %vm580_vm5 = vcmp.lt.s32.totalorder %v1952_v46, %v1941_v40  ;;  %vm583_vm6 = vcmp.lt.s32.totalorder %v1972_v54, %v1941_v40  ;;  %vm582_vm7 = vcmp.lt.s32.totalorder %v1982_v55, %v1941_v40 }
  0x1c   : > { %1438 = vmatprep.subr.bf16.mxu0 %v1437_v4  ;;  %v1445_v17 = vpack.c.bf16 %v620_v16, %v619_v15  ;;  %v622_v19 = vld [vmem:[%s2250_s3 + $0x18] sm:$0xff]  ;;  %v623_v21 = vld [vmem:[%s2250_s3 + $0x20] sm:$0xff]  ;;  %v624_v22 = vld [vmem:[%s2250_s3 + $0x28] sm:$0xff]  ;;  %vm585_vm8 = vcmp.lt.s32.totalorder %v2002_v60, %v1941_v40  ;;  %vm584_vm9 = vcmp.lt.s32.totalorder %v2012_v61, %v1941_v40  ;;  %s2148_s29 = scalar_lea.vmem (%p1865_p5), %s2236_s7, %s1328_s22  }
  0x1d   : > { %1440 = vmatpush3.bf16.msra.mxu0 %v1437_v4  ;;  %s1318_s21 = sshll.u32 %s390_s19, 3  ;;  %v1449_v20 = vpack.c.bf16 %v622_v19, %v621_v18  ;;  %v1453_v23 = vpack.c.bf16 %v624_v22, %v623_v21  ;;  %v625_v24 = vld [vmem:[%s2250_s3 + $0x30] sm:$0xff]  ;;  %v626_v25 = vld [vmem:[%s2250_s3 + $0x38] sm:$0xff]  ;;  %v1319_v27 = vld [vmem:[%s2251_s2] ss:$0 sm:$0xff] }
  0x1e   : > { %1442 = vmatprep.subr.bf16.mxu0 %v1441_v6  ;;  %s392_s27 = scalar_lea.vmem %s2249_s0, %s1318_s21  ;;  %1461 = vmatprep.subr.bf16.mxu1 %v1445_v17  ;;  %v1457_v26 = vpack.c.bf16 %v626_v25, %v625_v24  ;;  %v1338_v19 = vld [vmem:[%s2234_s5] ss:$0 sm:$0xff]  ;;  %s992_s21 = ssub.s32 (%p1865_p5), 17, %s1885_s12 }
  0x1f   : > { %v409_v7 = vld [vmem:[%s392_s27] sm:$0xff]  ;;  %v410_v8 = vld [vmem:[%s392_s27 + $0x8] sm:$0xff]  ;;  %v411_v9 = vld [vmem:[%s392_s27 + $0x10] sm:$0xff]  ;;  %1465 = vmatpush3.bf16.msra.mxu1 %v1445_v17  ;;  %s2100_s19 = scalar_select %p403_p11, %s1848_s6, 2 }
  0x20   : > { %1397 = vmatprep.mubr.msk.f32.mxu0 %vm428_vm0, %v409_v7  ;;  %v412_v10 = vld [vmem:[%s392_s27 + $0x18] sm:$0xff]  ;;  %v413_v11 = vld [vmem:[%s392_s27 + $0x20] sm:$0xff]  ;;  %v414_v12 = vld [vmem:[%s392_s27 + $0x28] sm:$0xff]  ;;  %1462 = vmatprep.subr.bf16.mxu1 %v1449_v20  ;;  %p993_p12 = scmp.lt.s32.totalorder (%p1865_p5), %s992_s21, 8 }
  0x21   : > { %1444 = vmatpush3.bf16.msra.mxu0 %v1441_v6  ;;  %v415_v13 = vld [vmem:[%s392_s27 + $0x30] sm:$0xff]  ;;  %v416_v14 = vld [vmem:[%s392_s27 + $0x38] sm:$0xff]  ;;  %s1316_s27 = sshll.u32 %s1928_s14, 6  ;;  %v1329_v6 = vld [vmem:[%s2252_s4] ss:$0 sm:$0xff]  ;;  %s408_s11 = scalar_lea.vmem %s2238_s9, %s2100_s19 }
  0x22   : > { %1446 = vmatprep.subr.bf16.mxu0 %v1445_v17  ;;  %s1964_s28 = scalar_lea.vmem [#allocation3], %s1316_s27   ;;  %s405_s27 = scalar_lea.vmem %s2237_s8, %s2100_s19 }
  0x23   : > { %1466 = vmatpush3.bf16.msra.mxu1 %v1449_v20 }
  0x24   : > { %1398 = vmatmul.mubr.msk.f32.vlgmr.msra.gmra.mrb[0].mxu0 %vm428_vm0, %v410_v8  ;;  %1463 = vmatprep.subr.bf16.mxu1 %v1453_v23 }
  0x25   : > { %1400 = vmatprep.mubr.msk.f32.mxu0 %vm428_vm0, %v411_v9  ;;  %1448 = vmatpush3.bf16.msra.mxu0 %v1445_v17 }
  0x26   : > { %1450 = vmatprep.subr.bf16.mxu0 %v1449_v20 }
  0x27   : > { %1467 = vmatpush3.bf16.msra.mxu1 %v1453_v23 }
  0x28   : > { %1401 = vmatmul.mubr.msk.f32.gmra.mrb[2].mxu0 %vm428_vm0, %v412_v10  ;;  %1464 = vmatprep.subr.bf16.mxu1 %v1457_v26 }
  0x29   : > { %1403 = vmatprep.mubr.msk.f32.mxu0 %vm428_vm0, %v413_v11  ;;  %1452 = vmatpush3.bf16.msra.mxu0 %v1449_v20 }
  0x2a   : > { %1454 = vmatprep.subr.bf16.mxu0 %v1453_v23 }
  0x2b   : > { %1468 = vmatpush3.bf16.msra.mxu1 %v1457_v26 }
  0x2c   : > { %1404 = vmatmul.mubr.msk.f32.gmra.mrb[4].mxu0 %vm428_vm0, %v414_v12 }
  0x2d   : > { %1406 = vmatprep.mubr.msk.f32.mxu0 %vm428_vm0, %v415_v13  ;;  %1456 = vmatpush3.bf16.msra.mxu0 %v1453_v23 }
  0x2e   : > { %1458 = vmatprep.subr.bf16.mxu0 %v1457_v26 }
  0x30   : > { %1407 = vmatmul.mubr.msk.f32.gmra.mrb[6].mxu0 %vm428_vm0, %v416_v14 }
  0x31   : > { %1460 = vmatpush3.bf16.msra.mxu0 %v1457_v26 }
  0xf7   : > { %v1399_v29 = vpop.f32.mrb[0].mxu0 }
  0xf8   : > { %v525_v30 = vadd.f32 %v1399_v29, %v1319_v27  ;;  %v519_v31 = vpop.f32.mrb[1].mxu0 }
  0xf9   : > { %v520_v32 = vadd.f32 %v1319_v27, %v519_v31 }
  0xfa   : > { %1575 = vtanh.f32 %v525_v30 }
  0xfb   : > { %1577 = vtanh.f32 %v520_v32  ;;  %v1402_v34 = vpop.f32.mrb[2].mxu0 }
  0xfc   : > { %v535_v35 = vadd.f32 %v1402_v34, %v1319_v27  ;;  %v529_v36 = vpop.f32.mrb[3].mxu0 }
  0xfd   : > { %v530_v37 = vadd.f32 %v1319_v27, %v529_v36 }
  0xfe   : > { %1579 = vtanh.f32 %v535_v35 }
  0xff   : > { %1581 = vtanh.f32 %v530_v37  ;;  %v1405_v39 = vpop.f32.mrb[4].mxu0 }
 0x100   : > { %v545_v41 = vadd.f32 %v1405_v39, %v1319_v27  ;;  %v539_v42 = vpop.f32.mrb[5].mxu0 }
 0x101   : > { %v540_v43 = vadd.f32 %v1319_v27, %v539_v42 }
 0x102   : > { %1583 = vtanh.f32 %v545_v41 }
 0x103   : > { %1585 = vtanh.f32 %v540_v43  ;;  %v1408_v45 = vpop.f32.mrb[6].mxu0  ;;  %v1767_v43 = vmov 0  }
 0x104   : > { %v1576_v47 = vpop.eup %1575  ;;  %v555_v48 = vadd.f32 %v1408_v45, %v1319_v27  ;;  %v549_v49 = vpop.f32.mrb[7].mxu0  ;;  %1574 = vset.pattern.permute.xlu1 %v1767_v43  ;;  %1573 = vset.pattern.permute.xlu0 %v1767_v43 }
 0x105   : > { %v1578_v50 = vpop.eup %1577  ;;  %v550_v51 = vadd.f32 %v1319_v27, %v549_v49  ;;  %v1957_v52 = vsel %vm579_vm1, %v1576_v47, 0.0  ;;  %v1339_v47 = vld [vmem:[#allocation2] ss:$0 sm:$0xff] }
 0x106   : > { %1587 = vtanh.f32 %v555_v48  ;;  %v1962_v53 = vsel %vm578_vm2, %v1578_v50, 0.0  ;;  %612 = vst.msk [vmem:[%s1964_s28 + $0x8] sm:$0xff] %vm610_vm3, %v1957_v52 }
 0x107   : > { %1589 = vtanh.f32 %v550_v51  ;;  %611 = vst.msk [vmem:[%s1964_s28] sm:$0xff] %vm610_vm3, %v1962_v53  ;;  %1425 = vmatprep.mubr.msk.f32.mxu0 %vm610_vm3, %v1962_v53 }
 0x108   : > { %v1580_v56 = vpop.eup %1579  ;;  %1426 = vmatmul.mubr.msk.f32.vlgmr.msra.gmra.mrb[8].mxu0 %vm610_vm3, %v1957_v52 }
 0x109   : > { %v1582_v57 = vpop.eup %1581  ;;  %v1989_v58 = vsel %vm581_vm4, %v1580_v56, 0.0 }
 0x10a   : > { %v1994_v59 = vsel %vm580_vm5, %v1582_v57, 0.0  ;;  %614 = vst.msk [vmem:[%s1964_s28 + $0x18] sm:$0xff] %vm610_vm3, %v1989_v58 }
 0x10b   : > { %613 = vst.msk [vmem:[%s1964_s28 + $0x10] sm:$0xff] %vm610_vm3, %v1994_v59  ;;  %1428 = vmatprep.mubr.msk.f32.mxu1 %vm610_vm3, %v1994_v59 }
 0x10c   : > { %v1584_v62 = vpop.eup %1583  ;;  %1429 = vmatmul.mubr.msk.f32.vlgmr.msra.gmra.mrb[0].mxu1 %vm610_vm3, %v1989_v58 }
 0x10d   : > { %v1586_v63 = vpop.eup %1585  ;;  %v2019_v0 = vsel %vm583_vm6, %v1584_v62, 0.0 }
 0x10e   : > { %v2024_v1 = vsel %vm582_vm7, %v1586_v63, 0.0  ;;  %616 = vst.msk [vmem:[%s1964_s28 + $0x28] sm:$0xff] %vm610_vm3, %v2019_v0 }
 0x10f   : > { %615 = vst.msk [vmem:[%s1964_s28 + $0x20] sm:$0xff] %vm610_vm3, %v2024_v1  ;;  %1431 = vmatprep.mubr.msk.f32.mxu1 %vm610_vm3, %v2024_v1 }
 0x110   : > { %v1588_v2 = vpop.eup %1587  ;;  %1432 = vmatmul.mubr.msk.f32.gmra.mrb[2].mxu1 %vm610_vm3, %v2019_v0 }
 0x111   : > { %v1590_v3 = vpop.eup %1589  ;;  %v2043_v4 = vsel %vm585_vm8, %v1588_v2, 0.0 }
 0x112   : > { %v2048_v5 = vsel %vm584_vm9, %v1590_v3, 0.0  ;;  %618 = vst.msk [vmem:[%s1964_s28 + $0x38] sm:$0xff] %vm610_vm3, %v2043_v4 }
 0x113   : > { %617 = vst.msk [vmem:[%s1964_s28 + $0x30] sm:$0xff] %vm610_vm3, %v2048_v5  ;;  %1434 = vmatprep.mubr.msk.f32.mxu1 %vm610_vm3, %v2048_v5 }
 0x114   : > { %1435 = vmatmul.mubr.msk.f32.gmra.mrb[4].mxu1 %vm610_vm3, %v2043_v4 }
 0x1db   : > { %v1427_v7 = vpop.f32.mrb[8].mxu0 }
 0x1dc   : > { %v730_v8 = vadd.f32 %v1427_v7, %v1329_v6  ;;  %v724_v9 = vpop.f32.mrb[9].mxu0 }
 0x1dd   : > { %v725_v10 = vadd.f32 %v1329_v6, %v724_v9 }
 0x1de   : > { %1591 = vtanh.f32 %v730_v8 }
 0x1df   : > { %v1430_v11 = vpop.f32.mrb[0].mxu1  ;;  %1593 = vtanh.f32 %v725_v10 }
 0x1e0   : > { %v740_v12 = vadd.f32 %v1430_v11, %v1329_v6  ;;  %v734_v13 = vpop.f32.mrb[1].mxu1 }
 0x1e1   : > { %v735_v14 = vadd.f32 %v1329_v6, %v734_v13 }
 0x1e2   : > { %1595 = vtanh.f32 %v740_v12 }
 0x1e3   : > { %v1433_v15 = vpop.f32.mrb[2].mxu1  ;;  %1597 = vtanh.f32 %v735_v14 }
 0x1e4   : > { %v750_v16 = vadd.f32 %v1433_v15, %v1329_v6  ;;  %v744_v17 = vpop.f32.mrb[3].mxu1 }
 0x1e5   : > { %v745_v18 = vadd.f32 %v1329_v6, %v744_v17 }
 0x1e7   : > { %1599 = vtanh.f32 %v745_v18  ;;  %v1436_v20 = vpop.f32.mrb[4].mxu1 }
 0x1e8   : > { %v1592_v21 = vpop.eup %1591  ;;  %1601 = vtanh.f32 %v750_v16  ;;  %v760_v22 = vadd.f32 %v1436_v20, %v1329_v6  ;;  %v754_v23 = vpop.f32.mrb[5].mxu1 }
 0x1e9   : > { %v755_v24 = vadd.f32 %v1329_v6, %v754_v23  ;;  %v779_v25 = vmul.f32 %v1592_v21, %v1338_v19  ;;  %v1594_v26 = vpop.eup %1593 }
 0x1ea   : > { %v778_v29 = vmul.f32 %v1594_v26, %v1338_v19 }
 0x1eb   : > { %1603 = vtanh.f32 %v755_v24  ;;  %788 = vadd.xlane.f32.xlu0 %v779_v25 }
 0x1ec   : > { %v1596_v27 = vpop.eup %1595  ;;  %1605 = vtanh.f32 %v760_v22 }
 0x1ed   : > { %v781_v28 = vmul.f32 %v1596_v27, %v1338_v19  ;;  %v1598_v30 = vpop.eup %1597 }
 0x1ee   : > { %v780_v32 = vmul.f32 %v1598_v30, %v1338_v19 }
 0x1ef   : > { %792 = vadd.xlane.f32.xlu1 %v781_v28  ;;  %786 = vadd.xlane.f32.xlu0 %v778_v29 }
 0x1f1   : > { %v1600_v31 = vpop.eup %1599 }
 0x1f2   : > { %v1602_v34 = vpop.eup %1601  ;;  %v782_v35 = vmul.f32 %v1600_v31, %v1338_v19 }
 0x1f3   : > { %790 = vadd.xlane.f32.xlu1 %v780_v32  ;;  %v783_v37 = vmul.f32 %v1602_v34, %v1338_v19 }
 0x1f4   : > { %794 = vadd.xlane.f32.xlu0 %v782_v35 }
 0x1f5   : > { %v1604_v36 = vpop.eup %1603 }
 0x1f6   : > { %v1606_v39 = vpop.eup %1605  ;;  %v784_v41 = vmul.f32 %v1604_v36, %v1338_v19 }
 0x1f7   : > { %796 = vadd.xlane.f32.xlu1 %v783_v37  ;;  %v785_v42 = vmul.f32 %v1606_v39, %v1338_v19 }
 0x1f8   : > { %798 = vadd.xlane.f32.xlu0 %v784_v41 }
 0x1fb   : > { %800 = vadd.xlane.f32.xlu1 %v785_v42 }
 0x278   : > { %v789_v45 = vpop.xlane.xlu0 %788 }
 0x279   : > { %v810_v50 = vadd.f32 %v1339_v47, %v789_v45 }
 0x27b   : > { %1607 = vtanh.f32 %v810_v50 }
 0x27c   : > { %v793_v48 = vpop.xlane.xlu1 %792  ;;  %v787_v49 = vpop.xlane.xlu0 %786 }
 0x27d   : > { %v812_v51 = vadd.f32 %v1339_v47, %v793_v48  ;;  %v809_v56 = vadd.f32 %v1339_v47, %v787_v49 }
 0x27f   : > { %1609 = vtanh.f32 %v812_v51 }
 0x280   : > { %v791_v57 = vpop.xlane.xlu1 %790  ;;  %1611 = vtanh.f32 %v809_v56 }
 0x281   : > { %v795_v62 = vpop.xlane.xlu0 %794  ;;  %v811_v63 = vadd.f32 %v1339_v47, %v791_v57 }
 0x282   : > { %v813_v2 = vadd.f32 %v1339_v47, %v795_v62 }
 0x284   : > { %v797_v3 = vpop.xlane.xlu1 %796  ;;  %1613 = vtanh.f32 %v813_v2 }
 0x285   : > { %v814_v6 = vadd.f32 %v1339_v47, %v797_v3  ;;  %v799_v7 = vpop.xlane.xlu0 %798  ;;  %1615 = vtanh.f32 %v811_v63  ;;  %v1608_v11 = vpop.eup %1607 }
 0x286   : > { %v815_v8 = vadd.f32 %v1339_v47, %v799_v7  ;;  %v826_v18 = vsel %vm579_vm1, %v1608_v11, -1e+30 }
 0x287   : > { %1617 = vtanh.f32 %v814_v6  ;;  %v835_v24 = vsel %vm833_vm10, %v826_v18, -inf }
 0x288   : > { %1619 = vtanh.f32 %v815_v8  ;;  %v801_v9 = vpop.xlane.xlu1 %800 }
 0x289   : > { %v816_v10 = vadd.f32 %v1339_v47, %v801_v9  ;;  %v1610_v12 = vpop.eup %1609 }
 0x28a   : > { %v1612_v13 = vpop.eup %1611  ;;  %v828_v23 = vsel %vm581_vm4, %v1610_v12, -1e+30 }
 0x28b   : > { %1621 = vtanh.f32 %v816_v10  ;;  %v825_v38 = vsel %vm578_vm2, %v1612_v13, -1e+30  ;;  %v837_v33 = vsel %vm833_vm10, %v828_v23, -inf }
 0x28c   : > { %v834_v27 = vsel %vm833_vm10, %v825_v38, -inf }
 0x28e   : > { %v1614_v14 = vpop.eup %1613 }
 0x28f   : > { %v1616_v15 = vpop.eup %1615  ;;  %v829_v19 = vsel %vm582_vm7, %v1614_v14, -1e+30 }
 0x290   : > { %v827_v55 = vsel %vm580_vm5, %v1616_v15, -1e+30  ;;  %v838_v25 = vsel %vm833_vm10, %v829_v19, -inf }
 0x291   : > { %v1618_v16 = vpop.eup %1617  ;;  %v836_v46 = vsel %vm833_vm10, %v827_v55, -inf  ;;  %v839_v29 = vmax.f32 %v834_v27, %v838_v25 }
 0x292   : > { %v1620_v17 = vpop.eup %1619  ;;  %v830_v20 = vsel %vm583_vm6, %v1618_v16, -1e+30 }
 0x293   : > { %v840_v21 = vsel %vm833_vm10, %v830_v20, -inf  ;;  %v831_v22 = vsel %vm584_vm9, %v1620_v17, -1e+30 }
 0x294   : > { %v842_v61 = vsel %vm833_vm10, %v831_v22, -inf  ;;  %v841_v26 = vmax.f32 %v835_v24, %v840_v21 }
 0x295   : > { %v1622_v54 = vpop.eup %1621  ;;  %v843_v30 = vmax.f32 %v836_v46, %v842_v61 }
 0x296   : > { %v832_v44 = vsel %vm585_vm8, %v1622_v54, -1e+30  ;;  %v846_v32 = vmax.f32 %v839_v29, %v841_v26 }
 0x297   : > { %v844_v28 = vsel %vm833_vm10, %v832_v44, -inf }
 0x298   : > { %v845_v31 = vmax.f32 %v837_v33, %v844_v28 }
 0x29a   : > { %v847_v34 = vmax.f32 %v843_v30, %v845_v31 }
 0x29c   : > { %v848_v35 = vmax.f32 %v846_v32, %v847_v34 }
 0x29e   : > { %v849_v36 = vrot.slane %v848_v35, 4 }
 0x2a0   : > { %v850_v37 = vmax.f32 %v848_v35, %v849_v36 }
 0x2a2   : > { %v851_v40 = vrot.slane %v850_v37, 2 }
 0x2a4   : > { %v852_v60 = vmax.f32 %v850_v37, %v851_v40 }
 0x2a6   : > { %v853_v39 = vrot.slane %v852_v60, 1 }
 0x2a8   : > { %v854_v41 = vmax.f32 %v852_v60, %v853_v39 }
 0x2aa   : > { %v856_v42 = vsub.f32 %v826_v18, %v854_v41  ;;  %v855_v43 = vsub.f32 %v825_v38, %v854_v41  ;;  %v857_v45 = vsub.f32 %v827_v55, %v854_v41  ;;  %970 = vst.msk [vmem:[%s405_s27] sm:$0x1] %vm969_vm11, %v854_v41  ;;  %v858_v47 = vsub.f32 %v828_v23, %v854_v41 }
 0x2ab   : > { %v859_v50 = vsub.f32 %v829_v19, %v854_v41  ;;  %v860_v57 = vsub.f32 %v830_v20, %v854_v41  ;;  %v861_v63 = vsub.f32 %v831_v22, %v854_v41  ;;  %v862_v2 = vsub.f32 %v832_v44, %v854_v41 }
 0x2ac   : > { %v865_v48 = vmul.f32 1.442695, %v856_v42  ;;  %v863_v49 = vmul.f32 1.442695, %v855_v43  ;;  %v867_v51 = vmul.f32 1.442695, %v857_v45 }
 0x2ad   : > { %v869_v56 = vmul.f32 1.442695, %v858_v47  ;;  %v871_v62 = vmul.f32 1.442695, %v859_v50  ;;  %v873_v3 = vmul.f32 1.442695, %v860_v57 }
 0x2ae   : > { %1623 = vpow2.f32 %v865_v48  ;;  %v875_v6 = vmul.f32 1.442695, %v861_v63  ;;  %v877_v7 = vmul.f32 1.442695, %v862_v2 }
 0x2af   : > { %1625 = vpow2.f32 %v863_v49 }
 0x2b0   : > { %1627 = vpow2.f32 %v867_v51 }
 0x2b1   : > { %1629 = vpow2.f32 %v869_v56 }
 0x2b2   : > { %1631 = vpow2.f32 %v871_v62 }
 0x2b3   : > { %1633 = vpow2.f32 %v873_v3 }
 0x2b4   : > { %1635 = vpow2.f32 %v875_v6 }
 0x2b5   : > { %1637 = vpow2.f32 %v877_v7 }
 0x2b8   : > { %v1624_v8 = vpop.eup %1623 }
 0x2b9   : > { %v1626_v9 = vpop.eup %1625  ;;  %907 = vperm.xlu1 %1574, %v1624_v8   ;;  %v880_v10 = vsel %vm833_vm10, %v1624_v8, 0.0 }
 0x2ba   : > { %v1628_v11 = vpop.eup %1627  ;;  %902 = vperm.xlu0 %1573, %v1626_v9   ;;  %v879_v12 = vsel %vm833_vm10, %v1626_v9, 0.0 }
 0x2bb   : > { %v1630_v13 = vpop.eup %1629  ;;  %v881_v14 = vadd.f32 %v880_v10, %v879_v12  ;;  %v882_v15 = vsel %vm833_vm10, %v1628_v11, 0.0 }
 0x2bc   : > { %v1632_v16 = vpop.eup %1631  ;;  %v884_v18 = vsel %vm833_vm10, %v1630_v13, 0.0 }
 0x2bd   : > { %912 = vperm.xlu1 %1574, %v1628_v11   ;;  %v883_v17 = vadd.f32 %v882_v15, %v881_v14  ;;  %v1634_v19 = vpop.eup %1633  ;;  %v886_v21 = vsel %vm833_vm10, %v1632_v16, 0.0 }
 0x2be   : > { %v1636_v22 = vpop.eup %1635  ;;  %v888_v38 = vsel %vm833_vm10, %v1634_v19, 0.0 }
 0x2bf   : > { %v885_v20 = vadd.f32 %v884_v18, %v883_v17  ;;  %v1638_v55 = vpop.eup %1637  ;;  %v890_v24 = vsel %vm833_vm10, %v1636_v22, 0.0 }
 0x2c0   : > { %v892_v61 = vsel %vm833_vm10, %v1638_v55, 0.0 }
 0x2c1   : > { %917 = vperm.xlu1 %1574, %v1630_v13   ;;  %v887_v23 = vadd.f32 %v886_v21, %v885_v20 }
 0x2c3   : > { %v889_v54 = vadd.f32 %v888_v38, %v887_v23 }
 0x2c5   : > { %922 = vperm.xlu1 %1574, %v1632_v16   ;;  %v891_v25 = vadd.f32 %v890_v24, %v889_v54 }
 0x2c7   : > { %v893_v26 = vadd.f32 %v892_v61, %v891_v25 }
 0x2c9   : > { %927 = vperm.xlu1 %1574, %v1634_v19   ;;  %v894_v44 = vrot.slane %v893_v26, 4 }
 0x2cb   : > { %v895_v33 = vadd.f32 %v894_v44, %v893_v26 }
 0x2cd   : > { %932 = vperm.xlu1 %1574, %v1636_v22   ;;  %v896_v27 = vrot.slane %v895_v33, 2 }
 0x2cf   : > { %v897_v46 = vadd.f32 %v896_v27, %v895_v33 }
 0x2d1   : > { %v898_v28 = vrot.slane %v897_v46, 1  ;;  %937 = vperm.xlu1 %1574, %v1638_v55  }
 0x2d3   : > { %v899_v29 = vadd.f32 %v898_v28, %v897_v46 }
 0x2d5   : > { %971 = vst.msk [vmem:[%s408_s11] sm:$0x1] %vm969_vm11, %v899_v29 }
 0x338   : > { %v908_v30 = vpop.permute.xlu1 %907 }
 0x339   : > { %v903_v32 = vpop.permute.xlu0 %902  ;;  %v941_v35 = vmul.f32 %v908_v30, %v1957_v52 }
 0x33a   : > { %v940_v36 = vmul.f32 %v903_v32, %v1962_v53 }
 0x33b   : > { %v949_v60 = vsel %vm610_vm3, %v941_v35, 0.0 }
 0x33c   : > { %v913_v31 = vpop.permute.xlu1 %912  ;;  %v948_v39 = vsel %vm610_vm3, %v940_v36, 0.0 }
 0x33d   : > { %v942_v37 = vmul.f32 %v913_v31, %v1994_v59  ;;  %v950_v45 = vadd.f32 %v949_v60, %v948_v39 }
 0x33f   : > { %v951_v42 = vsel %vm610_vm3, %v942_v37, 0.0 }
 0x340   : > { %v918_v34 = vpop.permute.xlu1 %917  ;;  %v952_v53 = vadd.f32 %v951_v42, %v950_v45 }
 0x341   : > { %v943_v41 = vmul.f32 %v918_v34, %v1989_v58 }
 0x343   : > { %v953_v48 = vsel %vm610_vm3, %v943_v41, 0.0 }
 0x344   : > { %v923_v40 = vpop.permute.xlu1 %922  ;;  %v954_v49 = vadd.f32 %v953_v48, %v952_v53 }
 0x345   : > { %v944_v43 = vmul.f32 %v923_v40, %v2024_v1 }
 0x347   : > { %v955_v59 = vsel %vm610_vm3, %v944_v43, 0.0 }
 0x348   : > { %v928_v47 = vpop.permute.xlu1 %927  ;;  %v956_v58 = vadd.f32 %v955_v59, %v954_v49 }
 0x349   : > { %v945_v52 = vmul.f32 %v928_v47, %v2019_v0 }
 0x34b   : > { %v957_v51 = vsel %vm610_vm3, %v945_v52, 0.0 }
 0x34c   : > { %v933_v50 = vpop.permute.xlu1 %932  ;;  %v958_v57 = vadd.f32 %v957_v51, %v956_v58 }
 0x34d   : > { %v946_v56 = vmul.f32 %v933_v50, %v2048_v5 }
 0x34f   : > { %v959_v1 = vsel %vm610_vm3, %v946_v56, 0.0 }
 0x350   : > { %v938_v62 = vpop.permute.xlu1 %937  ;;  %v960_v0 = vadd.f32 %v959_v1, %v958_v57 }
 0x351   : > { %v947_v63 = vmul.f32 %v938_v62, %v2043_v4 }
 0x353   : > { %v961_v2 = vsel %vm610_vm3, %v947_v63, 0.0 }
 0x354   : > { %v962_v3 = vadd.f32 %v961_v2, %v960_v0 }
 0x356   : > { %v963_v6 = vrot.slane %v962_v3, 4 }
 0x358   : > { %v964_v7 = vadd.f32 %v963_v6, %v962_v3 }
 0x35a   : > { %v965_v8 = vrot.slane %v964_v7, 2 }
 0x35c   : > { %v966_v9 = vadd.f32 %v965_v8, %v964_v7  ;;  %990 = sbr.rel (!%p1865_p5) target bundleno = 916 (0x394), region = 52 }
 0x35e   : > { %v967_v10 = vrot.slane %v966_v9, 1 }
 0x360   : > { %v968_v5 = vadd.f32 %v967_v10, %v966_v9 }
 0x362   : > { %973 = vst.msk [vmem:[%s2240_s13] sm:$0x1] %vm972_vm12, %v968_v5 }
 0x363   : > { %s2263_s21 = smov (!%p993_p12, %s992_s21), 8 }
 0x364   : > { %s1342_s30 = sshll.u32 %s2263_s21, 7 }
 0x365   : > { %p1345_p13 = scmp.eq.s32.totalorder %s1342_s30, 0 }
 0x366   : > { %s2154_s11 = sshrl.u32 (!%p1345_p13), %s2263_s21, 3 }
 0x367   : > { %1001 = sbr.rel (%p1345_p13) target bundleno = 916 (0x394), region = 56  ;;  %p1346_p0 = scmp.le.s32.totalorder (!%p1345_p13), %s2154_s11, 0 }
 0x36e   : > { %1241 = sbr.rel (%p1346_p0) target bundleno = 895 (0x37f), region = 173  ;;  %s2253_s12 = smov (!%p1346_p0), %s2148_s29 }
 0x36f   : > { %s2254_s22 = smov (!%p1346_p0), %s1964_s28  ;;  %s2163_s26 = smov (!%p1346_p0), 0  }
 0x370   : > { %s2165_s27 = smov (!%p1346_p0), 0  }
 0x375 LB: >> { %v1077_v4 = vld [vmem:[%s1741_s22] sm:$0xff]  ;;  %v1079_v11 = vld [vmem:[%s1741_s22 + $0x8] sm:$0xff]  ;;  %v1081_v12 = vld [vmem:[%s1741_s22 + $0x10] sm:$0xff]  ;;  %s1093_s30 = sadd.s32 1, %s1745_s26  ;;  %s1071_s27 = sadd.s32 1, %s1749_s27   ;;  %s1749_s27 = sphi %s2165_s27, %s1071_s27   ;;  %s1745_s26 = sphi %s2163_s26, %s2255_s26   ;;  %s1741_s22 = sphi %s2254_s22, %s1098_s22   ;;  %s1737_s12 = sphi %s2253_s12, %s1099_s12  }
 0x376   : >> { %1078 = vst [vmem:[%s1737_s12] sm:$0xff] %v1077_v4  ;;  %1080 = vst [vmem:[%s1737_s12 + $0x8] sm:$0xff] %v1079_v11  ;;  %v1083_v13 = vld [vmem:[%s1741_s22 + $0x18] sm:$0xff]  ;;  %v1085_v14 = vld [vmem:[%s1741_s22 + $0x20] sm:$0xff]  ;;  %p1094_p1 = scmp.ge.s32.totalorder %s1093_s30, %s2154_s11  ;;  %p1070_p2 = scmp.ge.s32.totalorder %s1071_s27, %s2154_s11 }
 0x377   : >> { %1082 = vst [vmem:[%s1737_s12 + $0x10] sm:$0xff] %v1081_v12  ;;  %v1087_v15 = vld [vmem:[%s1741_s22 + $0x28] sm:$0xff]  ;;  %1084 = vst [vmem:[%s1737_s12 + $0x18] sm:$0xff] %v1083_v13  ;;  %v1089_v16 = vld [vmem:[%s1741_s22 + $0x30] sm:$0xff] }
 0x378   : >> { %1086 = vst [vmem:[%s1737_s12 + $0x20] sm:$0xff] %v1085_v14  ;;  %1088 = vst [vmem:[%s1737_s12 + $0x28] sm:$0xff] %v1087_v15  ;;  %v1091_v17 = vld [vmem:[%s1741_s22 + $0x38] sm:$0xff]  ;;  %s2265_s30 = smov (%p1094_p1, %s1093_s30), 0  ;;  %1073 = sbr.rel (!%p1070_p2) target bundleno = 885 (0x375), region = 179 }
 0x379   : >> { %1090 = vst [vmem:[%s1737_s12 + $0x30] sm:$0xff] %v1089_v16  ;;  %1092 = vst [vmem:[%s1737_s12 + $0x38] sm:$0xff] %v1091_v17  ;;  %s1347_s19 = sshll.u32 %s2265_s30, 6  ;;  %s2255_s26 = smov %s2265_s30 }
 0x37a   : >> { %s1098_s22 = scalar_lea.vmem %s1964_s28, %s1347_s19 [#allocation3]   ;;  %s1099_s12 = scalar_lea.vmem %s2148_s29, %s1347_s19  }
 0x37f PF: > { %s2184_s13 = sand.u32 7, %s2263_s21   ;;  %s1359_s19 = sshll.u32 %s2154_s11, 6 }
 0x380   : > { %s1104_s0 = scalar_lea.vmem %s1964_s28, %s1359_s19 [#allocation3]   ;;  %s1106_s1 = scalar_lea.vmem %s2148_s29, %s1359_s19  }
 0x381   : > { %p1352_p3 = scmp.le.s32.totalorder %s2184_s13, 0 }
 0x382   : > { %s1751_s2 = smov (!%p1352_p3), %s1106_s1   ;;  %s1755_s3 = smov (!%p1352_p3), %s1104_s0  }
 0x383   : > { %1255 = sbr.rel (%p1352_p3) target bundleno = 916 (0x394), region = 184  ;;  %s1759_s4 = smov (!%p1352_p3), 0  }
 0x384   : > { %s1763_s30 = smov (!%p1352_p3), 0  }
 0x38a LB: >> { %v1116_v18 = vld [vmem:[%s1757_s3] sm:$0xff]  ;;  %s1118_s21 = sadd.s32 1, %s1761_s4  ;;  %s1110_s30 = sadd.s32 1, %s1765_s30   ;;  %s1765_s30 = sphi %s1763_s30, %s1110_s30   ;;  %s1761_s4 = sphi %s1759_s4, %s1760_s4   ;;  %s1757_s3 = sphi %s1755_s3, %s1123_s3   ;;  %s1753_s2 = sphi %s1751_s2, %s1124_s2  }
 0x38b   : >> { %1117 = vst [vmem:[%s1753_s2] sm:$0xff] %v1116_v18  ;;  %p1119_p4 = scmp.ge.s32.totalorder %s1118_s21, %s2184_s13  ;;  %p1109_p7 = scmp.ge.s32.totalorder %s1110_s30, %s2184_s13 }
 0x38d   : >> { %s2267_s21 = smov (%p1119_p4, %s1118_s21), 0  ;;  %1112 = sbr.rel (!%p1109_p7) target bundleno = 906 (0x38a), region = 190 }
 0x38e   : >> { %s1353_s28 = sshll.u32 %s2267_s21, 3  ;;  %s1760_s4 = smov %s2267_s21  }
 0x38f   : >> { %s1123_s3 = scalar_lea.vmem %s1104_s0, %s1353_s28 [#allocation3]   ;;  %s1124_s2 = scalar_lea.vmem %s1106_s1, %s1353_s28  }
 0x394 PF: > { %s1355_s4 = sshll.u32 %s1848_s6, 4  ;;  %s2256_s29 = scalar_lea.vmem [#allocation4], %s1928_s14 }
 0x395   : > { %s1143_s11 = sshll.u32 %s2256_s29, 4  ;;  %s1141_s26 = scalar_lea.hbm %s2239_s10, %s1355_s4  ;;  %s1144_s11 = int_to_ptr.vmem [resolvable:$true] %s1143_s11 }
 0x396   : > { %s1639_s27 = scalar_lea.vmem %s1144_s11, 16  ;;  %s1768_s2 = smov [#allocation4]  }
 0x397   : > { %p1640_p8 = scmp.ne.s32.totalorder %s1144_s11, %s1639_s27  ;;  %s1643_s0 = sshll.u32 %s1768_s2, 4  ;;  %s1644_s0 = int_to_ptr.vmem [resolvable:$false] %s1643_s0 }
 0x398   : > { %s1645_s1 = scalar_lea.vmem %s1644_s0, 32  ;;  %p1646_p11 = scmp.lt.s32.totalorder %s1144_s11, %s1644_s0 }
 0x399   : > { %p1641_p9 = pnand %p1640_p8, %p1865_p5  ;;  %p1647_p12 = scmp.lt.s32.totalorder %s1645_s1, %s1639_s27 }
 0x39b   : > { %p1642_p10 = pneg %p1641_p9  ;;  %p1648_p13 = por %p1647_p12, %p1646_p11 }
 0x39d   : > { %p1649_p0 = pnand %p1648_p13, %p1642_p10 }
 0x39f   : > { %1652 = shalt.err (!%p1649_p0)
}
 0x3a0   : > { %s1653_s3 = scalar_lea.hbm %s1141_s26, 16  ;;  %s1657_s19 = scalar_lea.hbm %s2239_s10, 48 }
 0x3a1   : > { %p1654_p1 = scmp.ne.s32.totalorder %s1141_s26, %s1653_s3  ;;  %p1658_p4 = scmp.lt.u32.totalorder %s1141_s26, %s2239_s10 }
 0x3a2   : > { %p1659_p7 = scmp.lt.u32.totalorder %s1657_s19, %s1653_s3  ;;  %p1661_p9 = scmp.lt.u32.totalorder %s1653_s3, %s1141_s26 }
 0x3a3   : > { %p1655_p2 = pnand %p1654_p1, %p1865_p5 }
 0x3a4   : > { %p1660_p8 = por %p1659_p7, %p1658_p4 }
 0x3a5   : > { %p1656_p3 = pneg %p1655_p2 }
 0x3a6   : > { %p1662_p11 = por %p1661_p9, %p1660_p8 }
 0x3a8   : > { %p1663_p10 = pnand %p1662_p11, %p1656_p3 }
 0x3aa   : > { %1666 = shalt.err (!%p1663_p10)
}
 0x3ab   : > { %s2257_s28 = scalar_lea.sflag [#allocation5], %s1928_s14 }
 0x3ac   : > { %1469 = dma.vmem_to_hbm [thread:$0]  (%p1865_p5), %s1144_s11, 16, %s1141_s26, %s2257_s28  }
 0x3ad PF: > { %p1475_p12 = scmp.ge.s32.totalorder %s1733_s18, 2  ;;  %s1174_s4 = sand.u32 1, %s1721_s15  }
 0x3ae   : > { %s1175_s29 = scalar_lea.sflag [#allocation5], %s1174_s4 }
 0x3af   : > { %p1472_p13 = pnand %p1475_p12, %p1869_p6 }
 0x3b1   : > { %1716 = dma.done.wait (!%p1472_p13), %s1175_s29, 16  }
 0x3b2   : > { %1718 = vsyncadd (!%p1472_p13), %s1175_s29, 4294967280  ;;  %p23_p0 = scmp.ge.s32.totalorder %s1852_s20, 5   ;;  %s2258_s15 = smov %s1725_s16 }
 0x3b3   : > { %s2259_s16 = smov %s1729_s17  ;;  %s2260_s17 = smov %s1863_s23 }
 0x3b4   : > { %s2261_s18 = smov %s1852_s20  ;;  %25 = sbr.rel (!%p23_p0) target bundleno = 9 (0x9), region = 201 }
 0x3bb   :  { %1179 = vsyncpa [#allocation5], 1 }
 0x3bc   :  { %1181 = vsyncpa [#allocation5 + $0x1], 1 }

</bundles_post_ra>
